<compile_context>
chip_gen: v6e
topology: v6e:2x2x1
jax: 0.10.0
libtpu: 0.0.40
codegen_flags: <defaults>
</compile_context>

<pallas_src>
import jax
import jax.numpy as jnp
from jax import lax
from jax.experimental import pallas as pl
from jax.experimental.pallas import tpu as pltpu


def _channel_block_kernel(x_ref, m1_ref, w2_ref, o_ref):
  """One batch image per grid step.

  x_ref : (1, C, H*W)  input image: channels on sublanes, pixels on lanes
  m1_ref: (C, C)       Toeplitz matrix of the (1,7) conv along channels
  w2_ref: (2, 1)       taps of the (2,1) conv mixing the avg/max rows
  o_ref : (1, C, H*W)  output = x * attn
  """
  x = x_ref[0].astype(jnp.float32)                       # (C, HW)

  # Global average / max pooling over the spatial (lane) axis.
  avg = jnp.mean(x, axis=1, keepdims=True)               # (C, 1)
  mx = jnp.max(x, axis=1, keepdims=True)                 # (C, 1)
  stats = jnp.concatenate([avg, mx], axis=1)             # (C, 2): col0=avg, col1=max

  # fc0[0]: (1,7) conv across channels (banded matmul), no bias, then ReLU.
  y = jnp.maximum(
      jnp.dot(m1_ref[...], stats, preferred_element_type=jnp.float32), 0.0)

  # fc0[1]: (2,1) conv -> linear mix of the avg/max rows, no bias, no act.
  logit = jnp.dot(y, w2_ref[...], preferred_element_type=jnp.float32)  # (C,1)

  attn = jax.nn.sigmoid(logit)                           # (C, 1)

  # Broadcast the per-channel attention over all H*W pixels (lane-dense store).
  o_ref[0] = (x * attn).astype(o_ref.dtype)


def channel_block(x_nchw, params):
  """NCHW in / NCHW out, matching the PyTorch ChannelBlock.forward."""
  N, C, H, W = x_nchw.shape
  HW = H * W

  x = x_nchw.reshape(N, C, HW)                           # free reshape, stays NCHW

  # Constant-fold the (1,7) cross-correlation (padding 3) along the channel
  # axis into a CxC banded matrix: out[c] = sum_t k[t] * in[c + t - 3].
  k7 = params["w_fc0_0"].reshape(-1).astype(jnp.float32)       # (7,)
  taps = k7.shape[0]
  pad = (taps - 1) // 2
  ci = jnp.arange(C)[:, None]
  cj = jnp.arange(C)[None, :]
  tidx = cj - ci + pad
  m1 = jnp.where((tidx >= 0) & (tidx < taps),
                 k7[jnp.clip(tidx, 0, taps - 1)], 0.0)          # (C, C)

  w2 = params["w_fc0_1"].reshape(2, 1).astype(jnp.float32)      # (2, 1)

  out = pl.pallas_call(
      _channel_block_kernel,
      out_shape=jax.ShapeDtypeStruct((N, C, HW), x_nchw.dtype),
      grid_spec=pltpu.PrefetchScalarGridSpec(
          num_scalar_prefetch=0,
          grid=(N,),
          in_specs=[
              pl.BlockSpec((1, C, HW), lambda n: (n, 0, 0)),    # x
              pl.BlockSpec((C, C), lambda n: (0, 0)),           # conv1 (Toeplitz)
              pl.BlockSpec((2, 1), lambda n: (0, 0)),           # conv2 taps
          ],
          out_specs=pl.BlockSpec((1, C, HW), lambda n: (n, 0, 0)),
      ),
      compiler_params=pltpu.CompilerParams(
          dimension_semantics=("parallel",)),
  )(x, m1, w2)

  return out.reshape(N, C, H, W)


def ref_forward(x, params):
  """Pure-JAX reference matching the PyTorch module (NCHW)."""
  N, C, H, W = x.shape
  avg = jnp.mean(x, axis=(2, 3), keepdims=True)          # (N,C,1,1)
  mx = jnp.max(x, axis=(2, 3), keepdims=True)            # (N,C,1,1)
  attn = jnp.concatenate([avg, mx], axis=3)              # (N,C,1,2)
  attn = jnp.transpose(attn, (0, 2, 3, 1))               # b c h w -> b h w c: (N,1,2,C)

  w0 = params["w_fc0_0"]                                 # (1,1,1,7) OIHW
  attn = lax.conv_general_dilated(
      attn, jnp.transpose(w0, (2, 3, 1, 0)),             # -> HWIO (1,7,1,1)
      window_strides=(1, 1), padding=((0, 0), (3, 3)),
      dimension_numbers=("NCHW", "HWIO", "NCHW"))
  attn = jnp.maximum(attn, 0.0)

  w1 = params["w_fc0_1"]                                 # (1,1,2,1) OIHW
  attn = lax.conv_general_dilated(
      attn, jnp.transpose(w1, (2, 3, 1, 0)),             # -> HWIO (2,1,1,1)
      window_strides=(1, 1), padding=((0, 0), (0, 0)),
      dimension_numbers=("NCHW", "HWIO", "NCHW"))        # (N,1,1,C)

  attn = jnp.transpose(attn, (0, 3, 1, 2))               # b h w c -> b c h w: (N,C,1,1)
  attn = jax.nn.sigmoid(attn)
  return x * attn


if __name__ == "__main__":
  N, C, H, W = 2, 4, 16, 16

  key = jax.random.PRNGKey(0)
  kx, kw0, kw1 = jax.random.split(key, 3)
  x = jax.random.normal(kx, (N, C, H, W), jnp.float32)
  params = dict(
      w_fc0_0=0.5 * jax.random.normal(kw0, (1, 1, 1, 7), jnp.float32),
      w_fc0_1=0.5 * jax.random.normal(kw1, (1, 1, 2, 1), jnp.float32),
  )

  out = channel_block(x, params)
  jax.block_until_ready(out)

  ref = ref_forward(x, params)
  assert out.shape == (N, C, H, W), out.shape
  if not jnp.allclose(out, ref, rtol=1e-4, atol=1e-4):
    raise AssertionError("Pallas kernel output mismatches reference")

  print("KERNEL_OK")
</pallas_src>

<mosaic_0001>
module attributes {stable_mosaic.version = 11 : i64} {
  func.func @_channel_block_kernel(%arg0: i32, %arg1: memref<1x4x256xf32, #tpu.memory_space<vmem>>, %arg2: memref<4x4xf32, #tpu.memory_space<vmem>>, %arg3: memref<2x1xf32, #tpu.memory_space<vmem>>, %arg4: memref<1x4x256xf32, #tpu.memory_space<vmem>>) attributes {dimension_semantics = [#tpu.dimension_semantics<parallel>], iteration_bounds = array<i64: 2>, scalar_prefetch = 0 : i64, scratch_operands = 0 : i64, tpu.core_type = #tpu.core_type<tc>, window_params = [{transform_indices = @transform_0, window_bounds = array<i64: 1, 4, 256>}, {pipeline_mode = #tpu.pipeline_mode<synchronous>, transform_indices = @transform_1, window_bounds = array<i64: 4, 4>}, {pipeline_mode = #tpu.pipeline_mode<synchronous>, transform_indices = @transform_2, window_bounds = array<i64: 2, 1>}, {transform_indices = @transform_3, window_bounds = array<i64: 1, 4, 256>}]} {
    %c0 = arith.constant 0 : index
    %c0_0 = arith.constant 0 : index
    %c0_1 = arith.constant 0 : index
    %0 = vector.load %arg1[%c0, %c0_0, %c0_1] : memref<1x4x256xf32, #tpu.memory_space<vmem>>, vector<1x4x256xf32>
    %1 = vector.shape_cast %0 : vector<1x4x256xf32> to vector<4x256xf32>
    %cst = arith.constant dense<0.000000e+00> : vector<4xf32>
    %2 = vector.multi_reduction <add>, %1, %cst [1] : vector<4x256xf32> to vector<4xf32>
    %3 = vector.shape_cast %2 : vector<4xf32> to vector<4x1xf32>
    %cst_2 = arith.constant 2.560000e+02 : f32
    %4 = vector.broadcast %cst_2 : f32 to vector<4x1xf32>
    %5 = arith.divf %3, %4 : vector<4x1xf32>
    %cst_3 = arith.constant dense<0xFF800000> : vector<4xf32>
    %6 = vector.multi_reduction <maximumf>, %1, %cst_3 [1] : vector<4x256xf32> to vector<4xf32>
    %7 = vector.shape_cast %6 : vector<4xf32> to vector<4x1xf32>
    %8 = tpu.concatenate %5, %7 in 1 : vector<4x1xf32>, vector<4x1xf32> -> vector<4x2xf32>
    %c0_4 = arith.constant 0 : index
    %c0_5 = arith.constant 0 : index
    %9 = vector.load %arg2[%c0_4, %c0_5] : memref<4x4xf32, #tpu.memory_space<vmem>>, vector<4x4xf32>
    %cst_6 = arith.constant dense<0.000000e+00> : vector<4x2xf32>
    %10 = tpu.matmul %9, %8, %cst_6 {dimension_numbers = #tpu.dot_dimension_numbers<[1], [0], [0], [1], [0, 0, 1, 1], [], []>} : vector<4x4xf32>, vector<4x2xf32>, vector<4x2xf32> -> vector<4x2xf32>
    %cst_7 = arith.constant 0.000000e+00 : f32
    %11 = vector.broadcast %cst_7 : f32 to vector<4x2xf32>
    %12 = arith.maximumf %10, %11 : vector<4x2xf32>
    %c0_8 = arith.constant 0 : index
    %c0_9 = arith.constant 0 : index
    %13 = vector.load %arg3[%c0_8, %c0_9] : memref<2x1xf32, #tpu.memory_space<vmem>>, vector<2x1xf32>
    %cst_10 = arith.constant dense<0.000000e+00> : vector<4x1xf32>
    %14 = tpu.matmul %12, %13, %cst_10 {dimension_numbers = #tpu.dot_dimension_numbers<[1], [0], [0], [1], [0, 0, 1, 1], [], []>} : vector<4x2xf32>, vector<2x1xf32>, vector<4x1xf32> -> vector<4x1xf32>
    %15 = arith.negf %14 : vector<4x1xf32>
    %16 = math.exp %15 : vector<4x1xf32>
    %cst_11 = arith.constant 1.000000e+00 : f32
    %17 = vector.broadcast %cst_11 : f32 to vector<4x1xf32>
    %18 = arith.addf %17, %16 : vector<4x1xf32>
    %19 = arith.divf %17, %18 : vector<4x1xf32>
    %20 = vector.broadcast %19 : vector<4x1xf32> to vector<4x256xf32>
    %21 = arith.mulf %1, %20 : vector<4x256xf32>
    %c0_12 = arith.constant 0 : index
    %c0_13 = arith.constant 0 : index
    %c0_14 = arith.constant 0 : index
    %22 = vector.load %arg4[%c0_12, %c0_13, %c0_14] : memref<1x4x256xf32, #tpu.memory_space<vmem>>, vector<1x4x256xf32>
    %23 = vector.shape_cast %22 : vector<1x4x256xf32> to vector<4x256xf32>
    %24 = vector.shape_cast %21 : vector<4x256xf32> to vector<1x4x256xf32>
    tpu.vector_store %arg4[%c0_12, %c0_13, %c0_14], %24 {strides = array<i32>} : memref<1x4x256xf32, #tpu.memory_space<vmem>>, vector<1x4x256xf32>,
    return
  }
  func.func @transform_0(%arg0: i32) -> (i32, i32, i32) {
    %c0_i32 = arith.constant 0 : i32
    %c0_i32_0 = arith.constant 0 : i32
    %c0_i32_1 = arith.constant 0 : i32
    return %arg0, %c0_i32, %c0_i32_0 : i32, i32, i32
  }
  func.func @transform_1(%arg0: i32) -> (i32, i32) {
    %c0_i32 = arith.constant 0 : i32
    %c0_i32_0 = arith.constant 0 : i32
    %c0_i32_1 = arith.constant 0 : i32
    return %c0_i32, %c0_i32_0 : i32, i32
  }
  func.func @transform_2(%arg0: i32) -> (i32, i32) {
    %c0_i32 = arith.constant 0 : i32
    %c0_i32_0 = arith.constant 0 : i32
    %c0_i32_1 = arith.constant 0 : i32
    return %c0_i32, %c0_i32_0 : i32, i32
  }
  func.func @transform_3(%arg0: i32) -> (i32, i32, i32) {
    %c0_i32 = arith.constant 0 : i32
    %c0_i32_0 = arith.constant 0 : i32
    %c0_i32_1 = arith.constant 0 : i32
    return %arg0, %c0_i32, %c0_i32_0 : i32, i32, i32
  }
}

</mosaic_0001>

<bundles_post_ra>
// kernel: tpu_custom_call.1
= control target key start
LH: loop header
LB: loop body
LE: loop exit
PB: predicated region body
PF: predicated region fallthrough
CT: control target
= control target key end

     0   :  { %8 = vsyncpa [#allocation3], 0  ;;  %s837_s0 = inlined_call_operand.hbm [shape: f32[2,4,256], index: 0, kind: input, shape index: {}]   ;;  %s838_s1 = inlined_call_operand.vmem [shape: f32[4,4], index: 1, kind: input, shape index: {}]   ;;  %s839_s2 = inlined_call_operand.vmem [shape: f32[2,1], index: 2, kind: input, shape index: {}]   ;;  %s840_s3 = inlined_call_operand.hbm [shape: f32[2,4,256], index: 3, kind: output, shape index: {}]  }
   0x1   :  { %10 = vsyncpa [#allocation3 + $0x1], 0 }
   0x2   :  { %11 = vsyncpa [#allocation4], 0 }
   0x3   :  { %13 = vsyncpa [#allocation4 + $0x1], 0  ;;  %s681_s12 = smov 0   ;;  %s683_s13 = smov 0  }
   0x4   :  { %s685_s14 = smov 0   ;;  %s687_s15 = smov 0  }
   0x5 LB: > { %s702_s16 = sadd.s32 4294967295, %s653_s15   ;;  %s469_s17 = sadd.s32 4294967294, %s653_s15   ;;  %s653_s15 = sphi %s687_s15, %s857_s15   ;;  %s649_s14 = sphi %s685_s14, %s856_s14   ;;  %s645_s13 = sphi %s683_s13, %s855_s13   ;;  %s641_s12 = sphi %s681_s12, %s854_s12  }
   0x6   : > { %s706_s18 = sadd.s32 1, %s653_s15   ;;  %s26_s19 = sadd.s32 1, %s649_s14 }
   0x7   : > { %s23_s20 = ssub.s32 %s653_s15, %s706_s18  ;;  %p33_p0 = scmp.ne.s32.totalorder %s649_s14, %s645_s13 }
   0x8   : > { %p24_p1 = scmp.eq.s32.totalorder %s23_s20, 0  ;;  %p34_p2 = scmp.eq.s32.totalorder %s653_s15, 0 }
   0x9   : > { %p39_p3 = scmp.ne.s32.totalorder %s645_s13, %s641_s12  ;;  %p40_p4 = scmp.eq.s32.totalorder %s702_s16, 0 }
   0xa   : > { %s718_s21 = scalar_select %p24_p1, %s649_s14, %s26_s19  }
   0xb   : > { %p720_p5 = por %p34_p2, %p33_p0  ;;  %p724_p6 = por %p40_p4, %p39_p3 }
   0xc   : > { %p105_p7 = scmp.eq.s32.totalorder %s702_s16, 1  ;;  %p111_p8 = scmp.eq.s32.totalorder %s469_s17, 1 }
   0xd   : > { %s844_s23 = scalar_select %p724_p6, 1, 0 }
   0xe   : > { %p516_p10 = scmp.lt.s32.totalorder %s653_s15, 2  ;;  %p731_p11 = por %p105_p7, %p33_p0 }
   0xf   : > { %p735_p12 = por %p111_p8, %p39_p3  ;;  %s137_s26 = sand.u32 1, %s649_s14  }
  0x10   : > { %s845_s24 = scalar_select %p731_p11, 1, 0 }
  0x11   : > { %s846_s25 = scalar_select %p735_p12, 1, 0 }
  0x12   : > { %s488_s27 = sshll.u32 %s653_s15, 7  ;;  %s472_s28 = sshll.u32 %s137_s26, 3 }
  0x13   : > { %s744_s4 = scalar_lea.hbm %s837_s0, %s488_s27  ;;  %s141_s5 = scalar_lea.vmem [#allocation2], %s472_s28 }
  0x14   : > { %s149_s6 = sshll.u32 %s141_s5, 4  ;;  %p748_p13 = pnand %p516_p10, %p720_p5  ;;  %s752_s6 = int_to_ptr.vmem [resolvable:$true] %s149_s6 }
  0x15   : > { %s138_s8 = scalar_lea.sflag [#allocation3], %s137_s26  ;;  %s561_s9 = scalar_lea.hbm %s744_s4, 128 }
  0x16   : > { %p562_p2 = scmp.ne.s32.totalorder %s744_s4, %s561_s9  ;;  %p563_p3 = pneg %p748_p13 }
  0x17   : > { %s566_s17 = scalar_lea.hbm %s837_s0, 256  ;;  %p567_p5 = scmp.lt.s32.totalorder %s744_s4, %s837_s0 }
  0x18   : > { %p564_p4 = pnand %p563_p3, %p562_p2  ;;  %p568_p8 = scmp.lt.s32.totalorder %s566_s17, %s561_s9 }
  0x1a   : > { %p565_p7 = pneg %p564_p4  ;;  %p569_p10 = por %p568_p8, %p567_p5 }
  0x1c   : > { %p570_p9 = pnand %p569_p10, %p565_p7 }
  0x1e   : > { %573 = shalt.err (!%p570_p9)
}
  0x1f   : > { %s574_s22 = scalar_lea.vmem %s752_s6, 128  ;;  %s655_s26 = smov [#allocation2]  }
  0x20   : > { %p575_p0 = scmp.ne.s32.totalorder %s752_s6, %s574_s22  ;;  %s579_s27 = sshll.u32 %s655_s26, 4  ;;  %s580_s27 = int_to_ptr.vmem [resolvable:$false] %s579_s27 }
  0x21   : > { %s581_s28 = scalar_lea.vmem %s580_s27, 256  ;;  %p582_p4 = scmp.lt.s32.totalorder %s752_s6, %s580_s27 }
  0x22   : > { %p577_p1 = pnand %p575_p0, %p563_p3  ;;  %p583_p12 = scmp.lt.s32.totalorder %s581_s28, %s574_s22 }
  0x24   : > { %p578_p2 = pneg %p577_p1  ;;  %p584_p11 = por %p583_p12, %p582_p4 }
  0x26   : > { %p585_p6 = pnand %p584_p11, %p578_p2 }
  0x28   : > { %588 = shalt.err (!%p585_p6)
}
  0x29   : > { %511 = dma.hbm_to_vmem [thread:$0]  (!%p748_p13), %s744_s4, 128, %s752_s6, %s138_s8  }
  0x2a   : > { %p848_p9 = scmp.lt.s32.totalorder %s653_s15, 3  ;;  %p849_p7 = scmp.ge.s32.totalorder %s653_s15, 1 }
  0x2c   : > { %p155_p0 = pnand %p849_p7, %p848_p9 }
  0x2d   : > { %s779_s29 = sand.u32 (!%p155_p0), 1, %s645_s13   ;;  %p850_p6 = scmp.ne.s32.totalorder (!%p155_p0), %s844_s23, 0 }
  0x2e   : > { %158 = sbr.rel (%p155_p0) target bundleno = 763 (0x2fb), region = 32  ;;  %s476_s30 = sshll.u32 (!%p155_p0), %s779_s29, 3 }
  0x2f   : > { %s161_s5 = scalar_lea.sflag (!%p155_p0), [#allocation3], %s779_s29  ;;  %s164_s7 = scalar_lea.vmem (!%p155_p0), [#allocation2], %s476_s30 }
  0x33   : > { %632 = dma.done.wait (%p850_p6), %s161_s5, 128  }
  0x34   : > { %634 = vsyncadd (%p850_p6), %s161_s5, 4294967168  ;;  %vm191_vm0 = vcmask 1043456   ;;  %v187_v0 = vld [vmem:[%s164_s7] sm:$0xff]  ;;  %v656_v8 = vmov 0.0   ;;  %vm657_vm1 = vmmov 0   ;;  %vm204_vm2 = vcmask 7168  }
  0x35   : > { %v189_v1 = vcombine.high %v187_v0, %v187_v0  ;;  %v192_v2 = vsel %vm191_vm0, %v187_v0, 0.0  ;;  %v199_v4 = vsel %vm191_vm0, %v187_v0, -inf  ;;  %494 = vmatprep.subr.mxu0 %v656_v8  ;;  %499 = vmatprep.subr.mxu1 %v656_v8  ;;  %v206_v12 = vld [vmem:[%s838_s1] sm:$0xf]  ;;  %vm207_vm3 = vcmask 31744   ;;  %s489_s9 = sshll.u32 %s702_s16, 7 }
  0x36   : > { %496 = vmatprep.mubr.msk.f32.mxu0 %vm657_vm1, %v656_v8  ;;  %501 = vmatprep.mubr.msk.f32.mxu1 %vm657_vm1, %v656_v8  ;;  %v285_v14 = vld [vmem:[%s839_s2] sm:$0x3]  ;;  %vm290_vm4 = vcmask 1041408   ;;  %vm286_vm5 = vcmask 15360   ;;  %v658_v18 = vmov 0   ;;  %v377_v27 = vlaneseq  ;;  %s186_s10 = scalar_lea.vmem [#allocation5], %s476_s30  ;;  %s397_s20 = scalar_lea.hbm %s840_s3, %s489_s9 }
  0x37   : > { %v193_v3 = vsel %vm191_vm0, %v189_v1, 0.0  ;;  %v200_v5 = vsel %vm191_vm0, %v189_v1, -inf  ;;  %500 = vmatpush3.msk.msra.mxu1 %vm290_vm4, %v285_v14  ;;  %554 = vset.pattern.permute.xlu1 %v658_v18  ;;  %v659_v25 = vmov 839922192   ;;  %s399_s11 = sshll.u32 %s186_s10, 4  ;;  %s385_s22 = scalar_lea.sflag [#allocation4], %s779_s29  ;;  %s400_s11 = int_to_ptr.vmem [resolvable:$true] %s399_s11 }
  0x38   : > { %v194_v6 = vadd.f32 %v193_v3, %v192_v2  ;;  %v201_v7 = vmax.f32 %v199_v4, %v200_v5  ;;  %555 = vset.pattern.permute.xlu0 %v658_v18  ;;  %v375_v26 = vunpack.c.l.s4 %v659_v25  ;;  %v378_v29 = vshrl.u32 %v377_v27, 7  ;;  %s589_s26 = scalar_lea.vmem %s400_s11, 128  ;;  %p851_p12 = scmp.ne.s32.totalorder %s845_s24, 0 }
  0x39   : > { %p590_p11 = scmp.ne.s32.totalorder %s400_s11, %s589_s26  ;;  %s660_s27 = smov [#allocation5]  }
  0x3a   : > { %195 = vadd.xlane.f32.xlu0 %v194_v6  ;;  %v376_v28 = vunpack.c.0.s8 %v375_v26  ;;  %s593_s28 = sshll.u32 %s660_s27, 4  ;;  %s594_s28 = int_to_ptr.vmem [resolvable:$false] %s593_s28 }
  0x3b   : > { %p591_p13 = pnand %p590_p11, %p851_p12  ;;  %s595_s16 = scalar_lea.vmem %s594_s28, 256 }
  0x3c   : > { %v379_v30 = vsub.s32 %v376_v28, %v378_v29  ;;  %p596_p3 = scmp.lt.s32.totalorder %s400_s11, %s594_s28  ;;  %p597_p5 = scmp.lt.s32.totalorder %s595_s16, %s589_s26 }
  0x3d   : > { %p592_p1 = pneg %p591_p13 }
  0x3e   : > { %202 = vmax.xlane.f32.xlu0 %v201_v7  ;;  %p598_p8 = por %p597_p5, %p596_p3 }
  0x40   : > { %p599_p10 = pnand %p598_p8, %p592_p1 }
  0xc3   : > { %v196_v9 = vpop.xlane.xlu0 %195 }
  0xc4   : > { %v198_v10 = vmul.f32 0.00390625, %v196_v9 }
  0xc7   : > { %v203_v11 = vpop.xlane.xlu0 %202 }
  0xc8   : > { %v205_v13 = vsel %vm204_vm2, %v198_v10, %v203_v11 }
  0xc9   : > { %495 = vmatpush3.msk.msra.mxu0 %vm191_vm0, %v205_v13 }
  0xca   : > { %497 = vmatmul.mubr.msk.f32.vlgmr.msra.gmra.mxu0 %vm207_vm3, %v206_v12 }
 0x18a   : > { %v280_v15 = vpop.f32.mrf.mxu0 }
 0x18b   : > { %v284_v16 = vmax.f32 %v280_v15, 0.0 }
 0x18c   : > { %v498_v17 = vpop.f32.mrf.mxu0 }
 0x18d   : > { %502 = vmatmul.mubr.msk.f32.vlgmr.msra.gmra.mxu1 %vm286_vm5, %v284_v16 }
 0x24d   : > { %v360_v19 = vpop.f32.mrf.mxu1 }
 0x24e   : > { %v482_v20 = vmul.f32 -1.442695, %v360_v19 }
 0x24f   : > { %v503_v21 = vpop.f32.mrf.mxu1 }
 0x250   : > { %557 = vpow2.f32 %v482_v20 }
 0x25d   : > { %v558_v22 = vpop.eup %557 }
 0x25e   : > { %v367_v23 = vadd.f32 1.0, %v558_v22 }
 0x260   : > { %559 = vrcp.f32 %v367_v23 }
 0x26d   : > { %v560_v24 = vpop.eup %559 }
 0x26e   : > { %372 = vperm.xlu1 %554, %v560_v24  }
 0x2e9   : > { %v373_v31 = vpop.permute.xlu1 %372 }
 0x2ea   : > { %v380_v32 = vrot.slane %v373_v31, %v379_v30 }
 0x2ec   : > { %v382_v33 = vmul.f32 %v380_v32, %v187_v0 }
 0x2ee   : > { %383 = vst [vmem:[%s186_s10] sm:$0xff] %v382_v33 }
 0x2ef   : > { %602 = shalt.err (!%p599_p10)
}
 0x2f0   : > { %s603_s30 = scalar_lea.hbm %s397_s20, 128  ;;  %s607_s7 = scalar_lea.hbm %s840_s3, 256 }
 0x2f1   : > { %p604_p2 = scmp.ne.s32.totalorder %s397_s20, %s603_s30  ;;  %p608_p7 = scmp.lt.s32.totalorder %s397_s20, %s840_s3 }
 0x2f2   : > { %p609_p0 = scmp.lt.s32.totalorder %s607_s7, %s603_s30 }
 0x2f3   : > { %p605_p4 = pnand %p604_p2, %p851_p12 }
 0x2f4   : > { %p610_p6 = por %p609_p0, %p608_p7 }
 0x2f5   : > { %p606_p9 = pneg %p605_p4 }
 0x2f7   : > { %p611_p11 = pnand %p610_p6, %p606_p9 }
 0x2f9   : > { %614 = shalt.err (!%p611_p11)
}
 0x2fa   : > { %506 = dma.vmem_to_hbm [thread:$0]  (%p851_p12), %s400_s11, 128, %s397_s20, %s385_s22  }
 0x2fb PF: > { %s411_s6 = sand.u32 1, %s641_s12   ;;  %p852_p13 = scmp.ne.s32.totalorder %s846_s25, 0 }
 0x2fc   : > { %p853_p1 = scmp.ge.s32.totalorder %s653_s15, 2  ;;  %s412_s8 = scalar_lea.sflag [#allocation4], %s411_s6 }
 0x2fe   : > { %p513_p3 = pnand %p853_p1, %p852_p13 }
 0x300   : > { %p514_p5 = pneg %p513_p3 }
 0x302   : > { %636 = dma.done.wait (%p514_p5), %s412_s8, 128  }
 0x303   : > { %638 = vsyncadd (%p514_p5), %s412_s8, 4294967168  ;;  %p16_p8 = scmp.ge.s32.totalorder %s706_s18, 4   ;;  %s854_s12 = smov %s645_s13 }
 0x304   : > { %s855_s13 = smov %s649_s14  ;;  %s856_s14 = smov %s718_s21 }
 0x305   : > { %s857_s15 = smov %s706_s18  ;;  %18 = sbr.rel (!%p16_p8) target bundleno = 5 (0x5), region = 77 }
 0x30a   :  { %417 = vsyncpa [#allocation3], 1 }
 0x30b   :  { %419 = vsyncpa [#allocation3 + $0x1], 1 }
 0x30c   :  { %420 = vsyncpa [#allocation4], 1 }
 0x30d   :  { %422 = vsyncpa [#allocation4 + $0x1], 1 }

</bundles_post_ra>
